<compile_context>
chip_gen: v7x
topology: tpu7x:2x2x1
jax: 0.10.0
libtpu: 0.0.40
codegen_flags: <defaults>
</compile_context>

<pallas_src>
import functools

import jax
import jax.numpy as jnp
from jax import lax
from jax.experimental import pallas as pl
from jax.experimental.pallas import tpu as pltpu

LANE_W = 128                       # lane-dense slab width (vreg lane count)
TARGET_BLOCK_BYTES = 16 * 1024 * 1024   # HBM DMA block per grid step
CHUNK_BYTES = 512 * 1024                # in-kernel compute chunk
NUM_CORE_SPLITS = 2                     # shard blocks across (up to) 2 TCs
VMEM_LIMIT_BYTES = 48 * 1024 * 1024     # 2x16 MiB buffers + chunk temps, v7x-safe


def _cdiv(a, b):
    return -(-a // b)


def _round_up(a, b):
    return _cdiv(a, b) * b


def _l2reg_kernel(rs_ref, x_ref, o_ref, acc_ref, *, block_rows, total_rows,
                  blocks_per_core, ch_rows, n_chunks, full_blocks, needs_mask):
    c = pl.program_id(0)   # parallel (core) axis
    k = pl.program_id(1)   # sequential reduction axis

    @pl.when(k == 0)
    def _():
        acc_ref[...] = jnp.zeros_like(acc_ref)

    def accumulate_chunk(xc):
        # xc: (ch_rows, 128) f32, already masked if needed.
        sq = xc * xc
        # Sum groups of 8 sublanes -> (8, 128): pure vreg adds on the VPU,
        # no cross-sublane XLU work until the final grid step.
        acc_ref[...] += jnp.sum(sq.reshape(ch_rows // 8, 8, LANE_W), axis=0)

    def hot_loop():
        # Fully-valid block: no masking on the hot path.
        def body(ci, carry):
            r0 = pl.multiple_of(ci * ch_rows, ch_rows)
            xc = x_ref[pl.ds(r0, ch_rows), :].astype(jnp.float32)
            accumulate_chunk(xc)
            return carry
        lax.fori_loop(0, n_chunks, body, 0)

    if needs_mask:
        logical = c * blocks_per_core + k
        is_full = logical < full_blocks

        @pl.when(is_full)
        def _():
            hot_loop()

        @pl.when(jnp.logical_not(is_full))
        def _():
            # Ragged last block (and, as a safety net only, any clamped
            # duplicate block, for which base_valid <= 0 -> fully masked).
            base_valid = total_rows - logical * block_rows
            row_ids = lax.broadcasted_iota(jnp.int32, (ch_rows, LANE_W), 0)

            def body(ci, carry):
                r0 = pl.multiple_of(ci * ch_rows, ch_rows)
                xc = x_ref[pl.ds(r0, ch_rows), :].astype(jnp.float32)
                valid = base_valid - ci * ch_rows
                # Mask BEFORE squaring so garbage rows cannot leak NaN/Inf.
                xm = jnp.where(row_ids < valid, xc, 0.0)
                accumulate_chunk(xm)
                return carry
            lax.fori_loop(0, n_chunks, body, 0)
    else:
        hot_loop()

    @pl.when(k == pl.num_programs(1) - 1)
    def _():
        o_ref[0, 0] = rs_ref[0, 0] * jnp.sum(acc_ref[...])


def l2reg(x, reg_strength=0.0):
    """Pallas equivalent of L2Reg.forward: reg_strength * (x**2).sum()."""
    rs = jnp.asarray(reg_strength, dtype=jnp.float32)

    flat = x.reshape(-1)
    n = flat.shape[0]
    if n == 0:
        return rs * jnp.float32(0.0)

    itemsize = jnp.dtype(x.dtype).itemsize
    rows = n // LANE_W
    rem = n % LANE_W

    # Sub-row tail (< 128 elems) is summed in plain JAX — no full-array pad.
    tail_sum = None
    if rem:
        tail = flat[n - rem:]
        tail_sum = jnp.sum(jnp.square(tail.astype(jnp.float32)))
        if rows == 0:
            return rs * tail_sum
        # TODO(synk): this prefix slice may materialize one copy of the bulk
        # on the rare unaligned path; lane-aligned tensors take the free path.
        flat = flat[: n - rem]

    x2d = flat.reshape(rows, LANE_W)   # free reshape, lane-dense slab

    # ---- dtype-aware, byte-targeted partition -------------------------------
    sub = max(8, 32 // itemsize)                                   # sublane mult
    ch_rows = max(sub, CHUNK_BYTES // (LANE_W * itemsize))          # 512 KiB chunk
    target_rows = max(ch_rows, TARGET_BLOCK_BYTES // (LANE_W * itemsize))  # 16 MiB

    num_splits = NUM_CORE_SPLITS if rows > ch_rows else 1
    blocks_per_core = max(1, _cdiv(rows, num_splits * target_rows))
    block_rows = min(target_rows,
                     _round_up(_cdiv(rows, num_splits * blocks_per_core), ch_rows))
    n_chunks = block_rows // ch_rows

    num_blocks_real = _cdiv(rows, block_rows)       # valid block indices
    total_logical = num_splits * blocks_per_core    # blocks the grid visits
    full_blocks = rows // block_rows                # blocks needing no mask
    needs_mask = total_logical > full_blocks

    grid = (num_splits, blocks_per_core)

    def x_index_map(c, k):
        # Balanced partition means no overrun in practice; the clamp is a
        # zero-cost safety net (any clamped duplicate is fully masked).
        return (jnp.minimum(c * blocks_per_core + k, num_blocks_real - 1), 0)

    kernel = functools.partial(
        _l2reg_kernel,
        block_rows=block_rows,
        total_rows=rows,
        blocks_per_core=blocks_per_core,
        ch_rows=ch_rows,
        n_chunks=n_chunks,
        full_blocks=full_blocks,
        needs_mask=needs_mask,
    )

    partials = pl.pallas_call(
        kernel,
        out_shape=jax.ShapeDtypeStruct((num_splits, 1), jnp.float32),
        grid_spec=pltpu.PrefetchScalarGridSpec(
            num_scalar_prefetch=0,
            grid=grid,
            in_specs=[
                pl.BlockSpec((1, 1), lambda c, k: (0, 0),
                             memory_space=pltpu.SMEM),             # reg_strength
                pl.BlockSpec((block_rows, LANE_W), x_index_map),    # streamed x
            ],
            out_specs=pl.BlockSpec((1, 1), lambda c, k: (c, 0),
                                   memory_space=pltpu.SMEM),
            scratch_shapes=[pltpu.VMEM((8, LANE_W), jnp.float32)],
        ),
        compiler_params=pltpu.CompilerParams(
            dimension_semantics=("parallel", "arbitrary"),
            vmem_limit_bytes=VMEM_LIMIT_BYTES,
        ),
    )(rs.reshape(1, 1), x2d)

    total = jnp.sum(partials)
    if tail_sum is not None:
        total = total + rs * tail_sum
    return total


if __name__ == "__main__":
    key = jax.random.PRNGKey(0)
    reg_strength = 0.01

    # Small NCHW input matching the PyTorch module's typical use.
    x = jax.random.normal(key, (2, 4, 16, 16), dtype=jnp.float32)
    result = l2reg(x, reg_strength)
    jax.block_until_ready(result)
    ref = reg_strength * jnp.sum(jnp.square(x))
    assert jnp.allclose(result, ref, rtol=1e-4, atol=1e-6), (result, ref)

    # (a) multi-block path: two-core split with a ragged last block.
    x2 = jax.random.normal(jax.random.PRNGKey(1), (1100, 1024), jnp.float32)
    r2 = l2reg(x2, 0.5)
    jax.block_until_ready(r2)
    ref2 = 0.5 * jnp.sum(jnp.square(x2))
    assert jnp.allclose(r2, ref2, rtol=1e-4, atol=1e-6), (r2, ref2)

    # (b) element count not a multiple of 128 -> pad-free tail path.
    x3 = jax.random.normal(jax.random.PRNGKey(2), (3, 5, 7, 11), jnp.float32)
    r3 = l2reg(x3, 0.25)
    jax.block_until_ready(r3)
    ref3 = 0.25 * jnp.sum(jnp.square(x3))
    assert jnp.allclose(r3, ref3, rtol=1e-4, atol=1e-6), (r3, ref3)

    print("KERNEL_OK")
</pallas_src>

<mosaic_0001>
module attributes {stable_mosaic.version = 11 : i64} {
  func.func @_l2reg_kernel(%arg0: i32, %arg1: i32, %arg2: memref<1x1xf32, #tpu.memory_space<smem>>, %arg3: memref<1024x128xf32, #tpu.memory_space<vmem>>, %arg4: memref<1x1xf32, #tpu.memory_space<smem>>, %arg5: memref<8x128xf32, #tpu.memory_space<vmem>>) attributes {dimension_semantics = [#tpu.dimension_semantics<parallel>, #tpu.dimension_semantics<arbitrary>], iteration_bounds = array<i64: 1, 1>, scalar_prefetch = 0 : i64, scratch_operands = 1 : i64, tpu.core_type = #tpu.core_type<tc>, window_params = [{transform_indices = @transform_0, window_bounds = array<i64: 1, 1>}, {transform_indices = @transform_1, window_bounds = array<i64: 1024, 128>}, {transform_indices = @transform_2, window_bounds = array<i64: 1, 1>}]} {
    %c0_i32 = arith.constant 0 : i32
    %0 = arith.cmpi eq, %arg1, %c0_i32 : i32
    %1 = arith.extui %0 : i1 to i32
    %c0_i32_0 = arith.constant 0 : i32
    %2 = arith.cmpi ne, %1, %c0_i32_0 : i32
    scf.if %2 {
      %cst = arith.constant 0.000000e+00 : f32
      %14 = vector.broadcast %cst : f32 to vector<8x128xf32>
      %c0 = arith.constant 0 : index
      %c0_6 = arith.constant 0 : index
      %15 = vector.load %arg5[%c0, %c0_6] : memref<8x128xf32, #tpu.memory_space<vmem>>, vector<8x128xf32>
      tpu.vector_store %arg5[%c0, %c0_6], %14 {strides = array<i32>} : memref<8x128xf32, #tpu.memory_space<vmem>>, vector<8x128xf32>,
    } else {
    }
    %c1_i32 = arith.constant 1 : i32
    %3 = arith.muli %arg0, %c1_i32 : i32
    %4 = arith.addi %3, %arg1 : i32
    %c0_i32_1 = arith.constant 0 : i32
    %5 = arith.cmpi slt, %4, %c0_i32_1 : i32
    %6 = arith.extui %5 : i1 to i32
    %c0_i32_2 = arith.constant 0 : i32
    %7 = arith.cmpi ne, %6, %c0_i32_2 : i32
    scf.if %7 {
      %c0_i32_6 = arith.constant 0 : i32
      %c1024_i32 = arith.constant 1024 : i32
      %14 = arith.muli %c0_i32_6, %c1024_i32 : i32
      %15 = tpu.assume_multiple %14, 1024 : i32
      %16 = arith.index_cast %15 : i32 to index
      %c0 = arith.constant 0 : index
      %17 = vector.load %arg3[%16, %c0] : memref<1024x128xf32, #tpu.memory_space<vmem>>, vector<1024x128xf32>
      %18 = arith.mulf %17, %17 : vector<1024x128xf32>
      %c0_7 = arith.constant 0 : index
      %c0_8 = arith.constant 0 : index
      %19 = vector.load %arg5[%c0_7, %c0_8] : memref<8x128xf32, #tpu.memory_space<vmem>>, vector<8x128xf32>
      %20 = vector.shape_cast %18 : vector<1024x128xf32> to vector<128x8x128xf32>
      %cst = arith.constant dense<0.000000e+00> : vector<8x128xf32>
      %21 = vector.multi_reduction <add>, %20, %cst [0] : vector<128x8x128xf32> to vector<8x128xf32>
      %22 = arith.addf %19, %21 : vector<8x128xf32>
      %c0_9 = arith.constant 0 : index
      %c0_10 = arith.constant 0 : index
      %23 = vector.load %arg5[%c0_9, %c0_10] : memref<8x128xf32, #tpu.memory_space<vmem>>, vector<8x128xf32>
      tpu.vector_store %arg5[%c0_9, %c0_10], %22 {strides = array<i32>} : memref<8x128xf32, #tpu.memory_space<vmem>>, vector<8x128xf32>,
      %c1_i32_11 = arith.constant 1 : i32
    } else {
    }
    %true = arith.constant true
    %8 = arith.xori %5, %true : i1
    %9 = arith.extui %8 : i1 to i32
    %c0_i32_3 = arith.constant 0 : i32
    %10 = arith.cmpi ne, %9, %c0_i32_3 : i32
    scf.if %10 {
      %c1024_i32 = arith.constant 1024 : i32
      %14 = arith.muli %4, %c1024_i32 : i32
      %c16_i32 = arith.constant 16 : i32
      %15 = arith.subi %c16_i32, %14 : i32
      %16 = tpu.iota {dimensions = array<i32: 0>} : vector<1024x128xi32>
      %c0_i32_6 = arith.constant 0 : i32
      %c1024_i32_7 = arith.constant 1024 : i32
      %17 = arith.muli %c0_i32_6, %c1024_i32_7 : i32
      %18 = tpu.assume_multiple %17, 1024 : i32
      %19 = arith.index_cast %18 : i32 to index
      %c0 = arith.constant 0 : index
      %20 = vector.load %arg3[%19, %c0] : memref<1024x128xf32, #tpu.memory_space<vmem>>, vector<1024x128xf32>
      %c1024_i32_8 = arith.constant 1024 : i32
      %21 = arith.muli %c0_i32_6, %c1024_i32_8 : i32
      %22 = arith.subi %15, %21 : i32
      %23 = vector.broadcast %22 : i32 to vector<1024x128xi32>
      %24 = arith.cmpi slt, %16, %23 : vector<1024x128xi32>
      %cst = arith.constant 0.000000e+00 : f32
      %25 = vector.broadcast %cst : f32 to vector<1024x128xf32>
      %26 = arith.select %24, %20, %25 : vector<1024x128xi1>, vector<1024x128xf32>
      %27 = arith.mulf %26, %26 : vector<1024x128xf32>
      %c0_9 = arith.constant 0 : index
      %c0_10 = arith.constant 0 : index
      %28 = vector.load %arg5[%c0_9, %c0_10] : memref<8x128xf32, #tpu.memory_space<vmem>>, vector<8x128xf32>
      %29 = vector.shape_cast %27 : vector<1024x128xf32> to vector<128x8x128xf32>
      %cst_11 = arith.constant dense<0.000000e+00> : vector<8x128xf32>
      %30 = vector.multi_reduction <add>, %29, %cst_11 [0] : vector<128x8x128xf32> to vector<8x128xf32>
      %31 = arith.addf %28, %30 : vector<8x128xf32>
      %c0_12 = arith.constant 0 : index
      %c0_13 = arith.constant 0 : index
      %32 = vector.load %arg5[%c0_12, %c0_13] : memref<8x128xf32, #tpu.memory_space<vmem>>, vector<8x128xf32>
      tpu.vector_store %arg5[%c0_12, %c0_13], %31 {strides = array<i32>} : memref<8x128xf32, #tpu.memory_space<vmem>>, vector<8x128xf32>,
      %c1_i32_14 = arith.constant 1 : i32
    } else {
    }
    %c0_i32_4 = arith.constant 0 : i32
    %11 = arith.cmpi eq, %arg1, %c0_i32_4 : i32
    %12 = arith.extui %11 : i1 to i32
    %c0_i32_5 = arith.constant 0 : i32
    %13 = arith.cmpi ne, %12, %c0_i32_5 : i32
    scf.if %13 {
      %c0 = arith.constant 0 : index
      %c0_6 = arith.constant 0 : index
      %14 = memref.load %arg2[%c0, %c0_6] : memref<1x1xf32, #tpu.memory_space<smem>>
      %c0_7 = arith.constant 0 : index
      %c0_8 = arith.constant 0 : index
      %15 = vector.load %arg5[%c0_7, %c0_8] : memref<8x128xf32, #tpu.memory_space<vmem>>, vector<8x128xf32>
      %16 = vector.shape_cast %15 : vector<8x128xf32> to vector<1x8x128xf32>
      %cst = arith.constant dense<0.000000e+00> : vector<1xf32>
      %17 = vector.multi_reduction <add>, %16, %cst [1, 2] : vector<1x8x128xf32> to vector<1xf32>
      %18 = vector.shape_cast %17 : vector<1xf32> to vector<1x1x1xf32>
      %19 = vector.extract %18[0, 0, 0] : f32 from vector<1x1x1xf32>
      %20 = arith.mulf %14, %19 : f32
      %c0_9 = arith.constant 0 : index
      %c0_10 = arith.constant 0 : index
      %21 = memref.load %arg4[%c0_9, %c0_10] : memref<1x1xf32, #tpu.memory_space<smem>>
      memref.store %20, %arg4[%c0_9, %c0_10] : memref<1x1xf32, #tpu.memory_space<smem>>
    } else {
    }
    return
  }
  func.func @transform_0(%arg0: i32, %arg1: i32) -> (i32, i32) {
    %c0_i32 = arith.constant 0 : i32
    %c0_i32_0 = arith.constant 0 : i32
    %c0_i32_1 = arith.constant 0 : i32
    return %c0_i32, %c0_i32_0 : i32, i32
  }
  func.func @transform_1(%arg0: i32, %arg1: i32) -> (i32, i32) {
    %c1_i32 = arith.constant 1 : i32
    %0 = arith.muli %arg0, %c1_i32 : i32
    %1 = arith.addi %0, %arg1 : i32
    %c0_i32 = arith.constant 0 : i32
    %2 = arith.minsi %1, %c0_i32 : i32
    %c0_i32_0 = arith.constant 0 : i32
    %c0_i32_1 = arith.constant 0 : i32
    return %2, %c0_i32_0 : i32, i32
  }
  func.func @transform_2(%arg0: i32, %arg1: i32) -> (i32, i32) {
    %c0_i32 = arith.constant 0 : i32
    %c0_i32_0 = arith.constant 0 : i32
    return %arg0, %c0_i32 : i32, i32
  }
}

</mosaic_0001>

<bundles_post_ra>
// kernel: tpu_custom_call.1
= control target key start
LH: loop header
LB: loop body
LE: loop exit
PB: predicated region body
PF: predicated region fallthrough
CT: control target
= control target key end

     0   :  { %8 = vsyncpa [#allocation5], 0  ;;  %s1338_s0 = inlined_call_operand.<no memory space> [shape: f32[1,1], index: 0, kind: input, shape index: {}]   ;;  %s1339_s1 = inlined_call_operand.hbm [shape: f32[16,128], index: 1, kind: input, shape index: {}]   ;;  %s1340_s2 = inlined_call_operand.hbm [shape: f32[1,1], index: 2, kind: output, shape index: {}]  }
   0x1   :  { %9 = vsyncpa [#allocation6], 0 }
   0x2   :  { %22 = vsyncadd [#allocation5], 16128  ;;  %s1292_s9 = smov [#allocation4]   ;;  %s1256_s13 = scalar_lea.hbm %s1339_s1, 256 }
   0x3   :  { %s27_s10 = sshll.u32 %s1292_s9, 4  ;;  %p1257_p0 = scmp.ne.s32.totalorder %s1339_s1, %s1256_s13  ;;  %s28_s10 = int_to_ptr.vmem [resolvable:$true] %s27_s10 }
   0x4   :  { %p1260_p1 = scmp.lt.u32.totalorder %s1256_s13, %s1339_s1 }
   0x6   :  { %p1262_p2 = pnand %p1260_p1, %p1257_p0 }
   0x8   :  { %1265 = shalt.err (!%p1262_p2)
}
   0x9   :  { %s1266_s18 = scalar_lea.vmem %s28_s10, 256  ;;  %s1270_s19 = scalar_lea.vmem %s28_s10, 16384 }
   0xa   :  { %p1267_p3 = scmp.ne.s32.totalorder %s28_s10, %s1266_s18  ;;  %p1271_p4 = scmp.lt.s32.totalorder %s28_s10, %s28_s10 }
   0xb   :  { %p1272_p5 = scmp.lt.s32.totalorder %s1270_s19, %s1266_s18 }
   0xd   :  { %p1273_p6 = por %p1272_p5, %p1271_p4 }
   0xf   :  { %p1274_p7 = pnand %p1273_p6, %p1267_p3 }
  0x11   :  { %1277 = shalt.err (!%p1274_p7)
}
  0x12   :  { %s1293_s20 = smov 128   ;;  %s1294_s21 = smov 8  }
  0x13   :  { %33 = dma.hbm_to_vmem [thread:$0]  %s1339_s1, 256, %s28_s10, [#allocation5], %s1293_s20, %s1293_s20, %s1294_s21  }
  0x14   :  { %1288 = dma.done.wait [#allocation5], 16384  }
  0x15   :  { %1289 = vsyncadd [#allocation5], 4294950912  ;;  %v574_v0 = vld [vmem:[#allocation4] sm:$0xff]  ;;  %v575_v1 = vld [vmem:[#allocation4 + $0x8] sm:$0xff]  ;;  %s1278_s29 = scalar_lea.hbm %s1340_s2, 16 }
  0x16   :  { %v959_v2 = vmul.f32 %v574_v0, %v574_v0  ;;  %v960_v3 = vmul.f32 %v575_v1, %v575_v1  ;;  %p1279_p8 = scmp.ne.s32.totalorder %s1340_s2, %s1278_s29  ;;  %p1282_p9 = scmp.lt.u32.totalorder %s1278_s29, %s1340_s2 }
  0x18   :  { %v1088_v4 = vadd.f32 %v960_v3, %v959_v2  ;;  %p1284_p10 = pnand %p1282_p9, %p1279_p8 }
  0x1a   :  { %1222 = vadd.xlane.f32.xlu0 %v1088_v4 }
  0xa7   :  { %v1223_v5 = vpop.xlane.xlu0 %1222 }
  0xa8   :  { %v1224_v6 = vrot.slane %v1223_v5, 4 }
  0xaa   :  { %v1225_v7 = vadd.f32 %v1224_v6, %v1223_v5 }
  0xac   :  { %v1226_v8 = vrot.slane %v1225_v7, 2 }
  0xae   :  { %v1227_v9 = vadd.f32 %v1226_v8, %v1225_v7 }
  0xb0   :  { %v1228_v10 = vrot.slane %v1227_v9, 1 }
  0xb2   :  { %v1229_v11 = vadd.f32 %v1228_v10, %v1227_v9 }
  0xb4   :  { %1250 = vpush %v1229_v11 }
  0xe5   :  { %s1251_s24 = spop %1250 }
  0xe6   :  { %s1231_s1 = smul.f32 %s1251_s24, %s1338_s0 }
  0xe8   :  { %1233 = sst [smem:[#allocation7]] %s1231_s1 }
  0xe9   :  { %1287 = shalt.err (!%p1284_p10)
}
  0xea   :  { %s1295_s6 = smov [#allocation7]  }
  0xeb   :  { %1241 = dma.smem_to_hbm %s1295_s6, 16, %s1340_s2, [#allocation6]  }
  0xec   :  { %1290 = dma.done.wait [#allocation6], 16  }
  0xed   :  { %1291 = vsyncadd [#allocation6], 4294967280 }
  0xee   :  { %1245 = sfence }
  0xef   :  { %1246 = vsyncpa [#allocation5], 1 }
  0xf0   :  { %1247 = vsyncpa [#allocation6], 1 }

</bundles_post_ra>
